<compile_context>
chip_gen: v5e
topology: v5e:2x2
jax: 0.10.0
libtpu: 0.0.40
codegen_flags: <defaults>
</compile_context>

<pallas_src>
import jax
import jax.numpy as jnp
from jax.experimental import pallas as pl
from jax.experimental.pallas import tpu as pltpu

# ---- network config --------------------------------------------------------
INPUT_DIM = 2
OUTPUT_DIM = 1
WIDTH = 32
DEPTH = 4          # -> total linear layers = DEPTH + 1 (first, DEPTH-1 hidden, last)
WEIGHT_STD = 0.1
N_HIDDEN = DEPTH - 1


def pinn_kernel(x_ref, w0_ref, b0_ref, wh_ref, bh_ref, wl_ref, bl_ref, o_ref):
    # x_ref: (INPUT_DIM, block_b)  -- batch on the lane axis.
    # First layer: K=INPUT_DIM=2 is far too shallow for the MXU; use VPU
    # broadcast multiply-adds instead (w0 column (WIDTH,1) x input row
    # (1, block_b) -> (WIDTH, block_b)).
    acc = b0_ref[...]                                    # (WIDTH, 1), broadcasts on first add
    for d in range(INPUT_DIM):
        acc = acc + w0_ref[:, d:d + 1] * x_ref[d:d + 1, :]
    h = jnp.tanh(acc)                                    # (WIDTH, block_b)

    # Hidden layers: (WIDTH, WIDTH) @ (WIDTH, block_b) streams along the large
    # batch dimension on the MXU; bias is a (WIDTH, 1) lane-broadcast add.
    # NOTE: bf16 activations/tanh would roughly double EUP throughput on
    # v6e/v7x (not v5e); kept f32 here to match the reference bit-for-bit.
    for l in range(N_HIDDEN):
        h = jnp.tanh(
            jnp.dot(wh_ref[l], h, preferred_element_type=jnp.float32)
            + bh_ref[l]
        )

    # Final layer, no activation. Output is lane-dense (OUTPUT_DIM, block_b).
    out = jnp.dot(wl_ref[...], h, preferred_element_type=jnp.float32) + bl_ref[...]
    o_ref[...] = out.astype(o_ref.dtype)


def pinn_forward(x, params, *, block_b=None):
    """x: (B, INPUT_DIM) float32. params: dict of (out,in) weights and (out,1) biases."""
    B = x.shape[0]
    if block_b is None:
        block_b = min(B, 512)
    assert block_b % 128 == 0, "block_b must be a multiple of 128 (lane width)"
    assert B % block_b == 0, "pad batch to a multiple of block_b"
    grid = (B // block_b,)

    w0, b0 = params["w0"], params["b0"]            # (W, IN),  (W, 1)
    wh, bh = params["wh"], params["bh"]            # (N_HIDDEN, W, W), (N_HIDDEN, W, 1)
    wl, bl = params["wl"], params["bl"]            # (OUT, W), (OUT, 1)

    x_t = x.T                                      # (INPUT_DIM, B): batch on lanes

    out_t = pl.pallas_call(
        pinn_kernel,
        out_shape=jax.ShapeDtypeStruct((OUTPUT_DIM, B), x.dtype),
        grid_spec=pltpu.PrefetchScalarGridSpec(
            num_scalar_prefetch=0,
            grid=grid,
            in_specs=[
                pl.BlockSpec((INPUT_DIM, block_b), lambda i: (0, i)),            # x tile (batch on lanes)
                pl.BlockSpec((WIDTH, INPUT_DIM), lambda i: (0, 0)),              # w0 (out, in)
                pl.BlockSpec((WIDTH, 1), lambda i: (0, 0)),                      # b0 (out, 1)
                pl.BlockSpec((N_HIDDEN, WIDTH, WIDTH), lambda i: (0, 0, 0)),     # wh
                pl.BlockSpec((N_HIDDEN, WIDTH, 1), lambda i: (0, 0, 0)),         # bh
                pl.BlockSpec((OUTPUT_DIM, WIDTH), lambda i: (0, 0)),             # wl
                pl.BlockSpec((OUTPUT_DIM, 1), lambda i: (0, 0)),                 # bl
            ],
            out_specs=pl.BlockSpec((OUTPUT_DIM, block_b), lambda i: (0, i)),     # lane-dense output slab
        ),
        compiler_params=pltpu.CompilerParams(
            dimension_semantics=("parallel",)
        ),
    )(x_t, w0, b0, wh, bh, wl, bl)

    return out_t.T                                 # (B, OUTPUT_DIM)


def init_params(key):
    """Deterministic uniform(0, WEIGHT_STD) init, matching PyTorch _initialize_weights.

    PyTorch nn.Linear stores weight as (out, in); we keep exactly that layout
    (no transpose needed for the batch-on-lanes kernel). Biases are (out, 1).
    """
    keys = jax.random.split(key, 2 * (DEPTH + 1))
    params = {}
    k = iter(keys)

    w0 = jax.random.uniform(next(k), (WIDTH, INPUT_DIM), jnp.float32, 0.0, WEIGHT_STD)
    b0 = jax.random.uniform(next(k), (WIDTH,), jnp.float32, 0.0, WEIGHT_STD)
    params["w0"] = w0                              # (W, IN)
    params["b0"] = b0.reshape(WIDTH, 1)

    wh, bh = [], []
    for _ in range(N_HIDDEN):
        w = jax.random.uniform(next(k), (WIDTH, WIDTH), jnp.float32, 0.0, WEIGHT_STD)
        b = jax.random.uniform(next(k), (WIDTH,), jnp.float32, 0.0, WEIGHT_STD)
        wh.append(w)
        bh.append(b.reshape(WIDTH, 1))
    params["wh"] = jnp.stack(wh, axis=0)           # (N_HIDDEN, W, W)
    params["bh"] = jnp.stack(bh, axis=0)           # (N_HIDDEN, W, 1)

    wl = jax.random.uniform(next(k), (OUTPUT_DIM, WIDTH), jnp.float32, 0.0, WEIGHT_STD)
    bl = jax.random.uniform(next(k), (OUTPUT_DIM,), jnp.float32, 0.0, WEIGHT_STD)
    params["wl"] = wl                              # (OUT, W)
    params["bl"] = bl.reshape(OUTPUT_DIM, 1)
    return params


def pinn_reference(x, params):
    """Pure-JAX reference matching the PyTorch forward (x @ W.T + b)."""
    h = jnp.tanh(x @ params["w0"].T + params["b0"].T)
    for l in range(N_HIDDEN):
        h = jnp.tanh(h @ params["wh"][l].T + params["bh"][l].T)
    return h @ params["wl"].T + params["bl"].T


if __name__ == "__main__":
    key = jax.random.PRNGKey(0)
    pkey, xkey = jax.random.split(key)

    params = init_params(pkey)

    # 512 collocation points, block_b=256 -> grid=(2,) so both v7x TCs get work.
    B = 512
    x = jax.random.uniform(xkey, (B, INPUT_DIM), jnp.float32, -1.0, 1.0)

    out = pinn_forward(x, params, block_b=256)
    out = jax.block_until_ready(out)

    ref = pinn_reference(x, params)
    assert out.shape == (B, OUTPUT_DIM)
    assert jnp.allclose(out, ref, atol=1e-5, rtol=1e-5), "mismatch vs reference"

    print("KERNEL_OK")
</pallas_src>

<mosaic_0001>
module attributes {stable_mosaic.version = 11 : i64} {
  func.func @pinn_kernel(%arg0: i32, %arg1: memref<2x256xf32, #tpu.memory_space<vmem>>, %arg2: memref<32x2xf32, #tpu.memory_space<vmem>>, %arg3: memref<32x1xf32, #tpu.memory_space<vmem>>, %arg4: memref<3x32x32xf32, #tpu.memory_space<vmem>>, %arg5: memref<3x32x1xf32, #tpu.memory_space<vmem>>, %arg6: memref<1x32xf32, #tpu.memory_space<vmem>>, %arg7: memref<1x1xf32, #tpu.memory_space<vmem>>, %arg8: memref<1x256xf32, #tpu.memory_space<vmem>>) attributes {dimension_semantics = [#tpu.dimension_semantics<parallel>], iteration_bounds = array<i64: 2>, scalar_prefetch = 0 : i64, scratch_operands = 0 : i64, tpu.core_type = #tpu.core_type<tc>, window_params = [{transform_indices = @transform_0, window_bounds = array<i64: 2, 256>}, {pipeline_mode = #tpu.pipeline_mode<synchronous>, transform_indices = @transform_1, window_bounds = array<i64: 32, 2>}, {pipeline_mode = #tpu.pipeline_mode<synchronous>, transform_indices = @transform_2, window_bounds = array<i64: 32, 1>}, {pipeline_mode = #tpu.pipeline_mode<synchronous>, transform_indices = @transform_3, window_bounds = array<i64: 3, 32, 32>}, {pipeline_mode = #tpu.pipeline_mode<synchronous>, transform_indices = @transform_4, window_bounds = array<i64: 3, 32, 1>}, {pipeline_mode = #tpu.pipeline_mode<synchronous>, transform_indices = @transform_5, window_bounds = array<i64: 1, 32>}, {pipeline_mode = #tpu.pipeline_mode<synchronous>, transform_indices = @transform_6, window_bounds = array<i64: 1, 1>}, {transform_indices = @transform_7, window_bounds = array<i64: 1, 256>}]} {
    %c0 = arith.constant 0 : index
    %c0_0 = arith.constant 0 : index
    %0 = vector.load %arg3[%c0, %c0_0] : memref<32x1xf32, #tpu.memory_space<vmem>>, vector<32x1xf32>
    %c0_1 = arith.constant 0 : index
    %c0_2 = arith.constant 0 : index
    %1 = vector.load %arg2[%c0_1, %c0_2] : memref<32x2xf32, #tpu.memory_space<vmem>>, vector<32x1xf32>
    %c0_3 = arith.constant 0 : index
    %c0_4 = arith.constant 0 : index
    %2 = vector.load %arg1[%c0_3, %c0_4] : memref<2x256xf32, #tpu.memory_space<vmem>>, vector<1x256xf32>
    %3 = vector.broadcast %1 : vector<32x1xf32> to vector<32x256xf32>
    %4 = vector.broadcast %2 : vector<1x256xf32> to vector<32x256xf32>
    %5 = arith.mulf %3, %4 : vector<32x256xf32>
    %6 = vector.broadcast %0 : vector<32x1xf32> to vector<32x256xf32>
    %7 = arith.addf %6, %5 : vector<32x256xf32>
    %c0_5 = arith.constant 0 : index
    %c1 = arith.constant 1 : index
    %8 = vector.load %arg2[%c0_5, %c1] : memref<32x2xf32, #tpu.memory_space<vmem>>, vector<32x1xf32>
    %c1_6 = arith.constant 1 : index
    %c0_7 = arith.constant 0 : index
    %9 = vector.load %arg1[%c1_6, %c0_7] : memref<2x256xf32, #tpu.memory_space<vmem>>, vector<1x256xf32>
    %10 = vector.broadcast %8 : vector<32x1xf32> to vector<32x256xf32>
    %11 = vector.broadcast %9 : vector<1x256xf32> to vector<32x256xf32>
    %12 = arith.mulf %10, %11 : vector<32x256xf32>
    %13 = arith.addf %7, %12 : vector<32x256xf32>
    %14 = math.tanh %13 : vector<32x256xf32>
    %c0_8 = arith.constant 0 : index
    %c0_9 = arith.constant 0 : index
    %c0_10 = arith.constant 0 : index
    %15 = vector.load %arg4[%c0_8, %c0_9, %c0_10] : memref<3x32x32xf32, #tpu.memory_space<vmem>>, vector<1x32x32xf32>
    %16 = vector.shape_cast %15 : vector<1x32x32xf32> to vector<32x32xf32>
    %cst = arith.constant dense<0.000000e+00> : vector<32x256xf32>
    %17 = tpu.matmul %16, %14, %cst {dimension_numbers = #tpu.dot_dimension_numbers<[1], [0], [0], [1], [0, 0, 1, 1], [], []>} : vector<32x32xf32>, vector<32x256xf32>, vector<32x256xf32> -> vector<32x256xf32>
    %c0_11 = arith.constant 0 : index
    %c0_12 = arith.constant 0 : index
    %c0_13 = arith.constant 0 : index
    %18 = vector.load %arg5[%c0_11, %c0_12, %c0_13] : memref<3x32x1xf32, #tpu.memory_space<vmem>>, vector<1x32x1xf32>
    %19 = vector.shape_cast %18 : vector<1x32x1xf32> to vector<32x1xf32>
    %20 = vector.broadcast %19 : vector<32x1xf32> to vector<32x256xf32>
    %21 = arith.addf %17, %20 : vector<32x256xf32>
    %22 = math.tanh %21 : vector<32x256xf32>
    %c1_14 = arith.constant 1 : index
    %c0_15 = arith.constant 0 : index
    %c0_16 = arith.constant 0 : index
    %23 = vector.load %arg4[%c1_14, %c0_15, %c0_16] : memref<3x32x32xf32, #tpu.memory_space<vmem>>, vector<1x32x32xf32>
    %24 = vector.shape_cast %23 : vector<1x32x32xf32> to vector<32x32xf32>
    %cst_17 = arith.constant dense<0.000000e+00> : vector<32x256xf32>
    %25 = tpu.matmul %24, %22, %cst_17 {dimension_numbers = #tpu.dot_dimension_numbers<[1], [0], [0], [1], [0, 0, 1, 1], [], []>} : vector<32x32xf32>, vector<32x256xf32>, vector<32x256xf32> -> vector<32x256xf32>
    %c1_18 = arith.constant 1 : index
    %c0_19 = arith.constant 0 : index
    %c0_20 = arith.constant 0 : index
    %26 = vector.load %arg5[%c1_18, %c0_19, %c0_20] : memref<3x32x1xf32, #tpu.memory_space<vmem>>, vector<1x32x1xf32>
    %27 = vector.shape_cast %26 : vector<1x32x1xf32> to vector<32x1xf32>
    %28 = vector.broadcast %27 : vector<32x1xf32> to vector<32x256xf32>
    %29 = arith.addf %25, %28 : vector<32x256xf32>
    %30 = math.tanh %29 : vector<32x256xf32>
    %c2 = arith.constant 2 : index
    %c0_21 = arith.constant 0 : index
    %c0_22 = arith.constant 0 : index
    %31 = vector.load %arg4[%c2, %c0_21, %c0_22] : memref<3x32x32xf32, #tpu.memory_space<vmem>>, vector<1x32x32xf32>
    %32 = vector.shape_cast %31 : vector<1x32x32xf32> to vector<32x32xf32>
    %cst_23 = arith.constant dense<0.000000e+00> : vector<32x256xf32>
    %33 = tpu.matmul %32, %30, %cst_23 {dimension_numbers = #tpu.dot_dimension_numbers<[1], [0], [0], [1], [0, 0, 1, 1], [], []>} : vector<32x32xf32>, vector<32x256xf32>, vector<32x256xf32> -> vector<32x256xf32>
    %c2_24 = arith.constant 2 : index
    %c0_25 = arith.constant 0 : index
    %c0_26 = arith.constant 0 : index
    %34 = vector.load %arg5[%c2_24, %c0_25, %c0_26] : memref<3x32x1xf32, #tpu.memory_space<vmem>>, vector<1x32x1xf32>
    %35 = vector.shape_cast %34 : vector<1x32x1xf32> to vector<32x1xf32>
    %36 = vector.broadcast %35 : vector<32x1xf32> to vector<32x256xf32>
    %37 = arith.addf %33, %36 : vector<32x256xf32>
    %38 = math.tanh %37 : vector<32x256xf32>
    %c0_27 = arith.constant 0 : index
    %c0_28 = arith.constant 0 : index
    %39 = vector.load %arg6[%c0_27, %c0_28] : memref<1x32xf32, #tpu.memory_space<vmem>>, vector<1x32xf32>
    %cst_29 = arith.constant dense<0.000000e+00> : vector<1x256xf32>
    %40 = tpu.matmul %39, %38, %cst_29 {dimension_numbers = #tpu.dot_dimension_numbers<[1], [0], [0], [1], [0, 0, 1, 1], [], []>} : vector<1x32xf32>, vector<32x256xf32>, vector<1x256xf32> -> vector<1x256xf32>
    %c0_30 = arith.constant 0 : index
    %c0_31 = arith.constant 0 : index
    %41 = vector.load %arg7[%c0_30, %c0_31] : memref<1x1xf32, #tpu.memory_space<vmem>>, vector<1x1xf32>
    %42 = vector.broadcast %41 : vector<1x1xf32> to vector<1x256xf32>
    %43 = arith.addf %40, %42 : vector<1x256xf32>
    %c0_32 = arith.constant 0 : index
    %c0_33 = arith.constant 0 : index
    %44 = vector.load %arg8[%c0_32, %c0_33] : memref<1x256xf32, #tpu.memory_space<vmem>>, vector<1x256xf32>
    tpu.vector_store %arg8[%c0_32, %c0_33], %43 {strides = array<i32>} : memref<1x256xf32, #tpu.memory_space<vmem>>, vector<1x256xf32>,
    return
  }
  func.func @transform_0(%arg0: i32) -> (i32, i32) {
    %c0_i32 = arith.constant 0 : i32
    %c0_i32_0 = arith.constant 0 : i32
    return %c0_i32, %arg0 : i32, i32
  }
  func.func @transform_1(%arg0: i32) -> (i32, i32) {
    %c0_i32 = arith.constant 0 : i32
    %c0_i32_0 = arith.constant 0 : i32
    %c0_i32_1 = arith.constant 0 : i32
    return %c0_i32, %c0_i32_0 : i32, i32
  }
  func.func @transform_2(%arg0: i32) -> (i32, i32) {
    %c0_i32 = arith.constant 0 : i32
    %c0_i32_0 = arith.constant 0 : i32
    %c0_i32_1 = arith.constant 0 : i32
    return %c0_i32, %c0_i32_0 : i32, i32
  }
  func.func @transform_3(%arg0: i32) -> (i32, i32, i32) {
    %c0_i32 = arith.constant 0 : i32
    %c0_i32_0 = arith.constant 0 : i32
    %c0_i32_1 = arith.constant 0 : i32
    %c0_i32_2 = arith.constant 0 : i32
    return %c0_i32, %c0_i32_0, %c0_i32_1 : i32, i32, i32
  }
  func.func @transform_4(%arg0: i32) -> (i32, i32, i32) {
    %c0_i32 = arith.constant 0 : i32
    %c0_i32_0 = arith.constant 0 : i32
    %c0_i32_1 = arith.constant 0 : i32
    %c0_i32_2 = arith.constant 0 : i32
    return %c0_i32, %c0_i32_0, %c0_i32_1 : i32, i32, i32
  }
  func.func @transform_5(%arg0: i32) -> (i32, i32) {
    %c0_i32 = arith.constant 0 : i32
    %c0_i32_0 = arith.constant 0 : i32
    %c0_i32_1 = arith.constant 0 : i32
    return %c0_i32, %c0_i32_0 : i32, i32
  }
  func.func @transform_6(%arg0: i32) -> (i32, i32) {
    %c0_i32 = arith.constant 0 : i32
    %c0_i32_0 = arith.constant 0 : i32
    %c0_i32_1 = arith.constant 0 : i32
    return %c0_i32, %c0_i32_0 : i32, i32
  }
  func.func @transform_7(%arg0: i32) -> (i32, i32) {
    %c0_i32 = arith.constant 0 : i32
    %c0_i32_0 = arith.constant 0 : i32
    return %c0_i32, %arg0 : i32, i32
  }
}

</mosaic_0001>

<bundles_post_ra>
// kernel: tpu_custom_call.1
= control target key start
LH: loop header
LB: loop body
LE: loop exit
PB: predicated region body
PF: predicated region fallthrough
CT: control target
= control target key end

     0   :  { %s1357_s0 = inlined_call_operand.vmem [shape: f32[2,512], index: 0, kind: input, shape index: {}]   ;;  %s1358_s1 = inlined_call_operand.vmem [shape: f32[32,2], index: 1, kind: input, shape index: {}]   ;;  %s1359_s2 = inlined_call_operand.vmem [shape: f32[32,1], index: 2, kind: input, shape index: {}]   ;;  %s1360_s3 = inlined_call_operand.vmem [shape: f32[3,32,32], index: 3, kind: input, shape index: {}]   ;;  %s1361_s4 = inlined_call_operand.vmem [shape: f32[3,32,1], index: 4, kind: input, shape index: {}]   ;;  %s1362_s5 = inlined_call_operand.vmem [shape: f32[1,32], index: 5, kind: input, shape index: {}]   ;;  %s1363_s6 = inlined_call_operand.<no memory space> [shape: f32[1,1], index: 6, kind: input, shape index: {}]   ;;  %s1364_s7 = inlined_call_operand.hbm [shape: f32[1,512], index: 7, kind: output, shape index: {}]  }
   0x1   :  { %v12_v0 = vstv %s1363_s6 }
   0x2   :  { %13 = vst [vmem:[#allocation2] sm:$0x1] %v12_v0 }
   0x3   :  { %14 = vsyncpa [#allocation4], 0 }
   0x4   :  { %16 = vsyncpa [#allocation4 + $0x1], 0  ;;  %s1144_s26 = smov 0   ;;  %s1146_s27 = smov 0  }
   0x5   :  { %s1148_s28 = smov 0   ;;  %s1150_s29 = smov 0  }
   0x6 LB: > { %s858_s6 = sadd.s32 4294967295, %s1097_s29   ;;  %s859_s30 = sadd.s32 4294967294, %s1097_s29   ;;  %s1097_s29 = sphi %s1150_s29, %s1370_s29   ;;  %s1093_s28 = sphi %s1148_s28, %s1369_s28   ;;  %s1089_s27 = sphi %s1146_s27, %s1368_s27   ;;  %s1085_s26 = sphi %s1144_s26, %s1367_s26  }
   0x7   : > { %s1167_s8 = sadd.s32 1, %s1097_s29   ;;  %s181_s9 = sadd.s32 1, %s1093_s28 }
   0x8   : > { %s178_s10 = ssub.s32 %s1097_s29, %s1167_s8  ;;  %p191_p0 = scmp.ne.s32.totalorder %s1093_s28, %s1089_s27 }
   0x9   : > { %p179_p1 = scmp.eq.s32.totalorder %s178_s10, 0  ;;  %p192_p2 = scmp.eq.s32.totalorder %s858_s6, 1 }
   0xa   : > { %p197_p3 = scmp.ne.s32.totalorder %s1089_s27, %s1085_s26  ;;  %p198_p4 = scmp.eq.s32.totalorder %s859_s30, 1 }
   0xb   : > { %s1179_s11 = scalar_select %p179_p1, %s1093_s28, %s181_s9  }
   0xc   : > { %p1181_p5 = por %p192_p2, %p191_p0  ;;  %p1185_p6 = por %p198_p4, %p197_p3 }
   0xd   : > { %p862_p7 = scmp.ge.s32.totalorder %s1097_s29, 1  ;;  %p243_p8 = scmp.lt.s32.totalorder %s1097_s29, 3 }
   0xf   : > { %p244_p9 = pnand %p862_p7, %p243_p8 }
  0x10   : > { %s1229_s23 = sshll.u32 (!%p244_p9), %s858_s6, 1  ;;  %s272_s30 = sand.u32 (!%p244_p9), 1, %s1089_s27  }
  0x11   : > { %247 = sbr.rel (%p244_p9) target bundleno = 817 (0x331), region = 48  ;;  %p276_p10 = scmp.lt.s32.totalorder (!%p244_p9), %s1229_s23, 3 }
  0x12   : > { %s863_s9 = sshll.u32 (!%p244_p9), %s272_s30, 1  ;;  %s795_s15 = scalar_lea.hbm (!%p244_p9), %s1364_s7, %s1229_s23 }
  0x13   : > { %s274_s6 = scalar_lea.vmem (!%p244_p9), [#allocation3], %s863_s9  ;;  %s799_s17 = sshll.u32 (!%p244_p9), %s795_s15, 4  ;;  %s800_s17 = int_to_ptr.hbm [resolvable:$true] %s799_s17 }
  0x14   : > { %s797_s16 = sshll.u32 (!%p244_p9), %s274_s6, 4  ;;  %s785_s18 = scalar_lea.sflag (!%p244_p9), [#allocation4], %s272_s30  ;;  %s798_s16 = int_to_ptr.vmem [resolvable:$true] %s797_s16 }
  0x15   : > { %s1049_s19 = sshra.s32 (!%p244_p9), %s800_s17, 4  ;;  %s1055_s22 = scalar_lea.hbm (!%p244_p9), %s1364_s7, 4  ;;  %s1050_s19 = int_to_ptr.hbm [resolvable:$true] %s1049_s19 }
  0x16   : > { %v289_v1 = vld [vmem:[%s1358_s1 + $0x18] sm:$0xff]  ;;  %v287_v2 = vld [vmem:[%s1358_s1 + $0x8] sm:$0xff]  ;;  %v1099_v4 = vmov 0   ;;  %v284_v5 = vld [vmem:[%s1359_s2 + $0x10] sm:$0xff]  ;;  %v1100_v7 = vmov 1   ;;  %s277_s24 = scalar_select %p276_p10, %s1229_s23, 3 }
  0x17   : > { %v285_v3 = vld [vmem:[%s1359_s2 + $0x18] sm:$0xff]  ;;  %965 = vset.pattern.permute.xlu2 %v1099_v4  ;;  %963 = vset.pattern.permute.xlu1 %v1099_v4  ;;  %v288_v6 = vld [vmem:[%s1358_s1 + $0x10] sm:$0xff]  ;;  %v283_v8 = vld [vmem:[%s1359_s2 + $0x8] sm:$0xff]  ;;  %vm427_vm0 = vcmask 261120   ;;  %vm776_vm1 = vcmask 1040384   ;;  %s1051_s23 = scalar_lea.hbm %s1050_s19, 2  ;;  %p1056_p0 = scmp.lt.s32.totalorder %s1050_s19, %s1364_s7 }
  0x18   : > { %962 = vset.pattern.permute.xlu0 %v1099_v4  ;;  %298 = vperm.xlu2 %965, %v287_v2   ;;  %v286_v9 = vld [vmem:[%s1358_s1] sm:$0xff]  ;;  %v405_v11 = vld [vmem:[%s1361_s4 + $0x10] sm:$0xff]  ;;  %v882_v12 = vld [vmem:[%s1361_s4 + $0x38] sm:$0xff]  ;;  %s865_s25 = sshll.u32 %s277_s24, 1  ;;  %p1052_p11 = scmp.ne.s32.totalorder %s1050_s19, %s1051_s23 }
  0x19   : > { %308 = vperm.xlu0 %962, %v289_v1   ;;  %341 = vperm.xlu1 %963, %v285_v3   ;;  %v282_v10 = vld [vmem:[%s1359_s2] sm:$0xff]  ;;  %v880_v13 = vld [vmem:[%s1361_s4 + $0x28] sm:$0xff]  ;;  %v897_v14 = vld [vmem:[%s1361_s4 + $0x50] sm:$0xff]  ;;  %s279_s10 = scalar_lea.vmem %s1357_s0, %s865_s25  ;;  %p1057_p1 = scmp.lt.s32.totalorder %s1055_s22, %s1051_s23 }
  0x1a   : > { %v723_v15 = vld [vmem:[#allocation2] sm:$0x1]  ;;  %v406_v20 = vld [vmem:[%s1361_s4 + $0x18] sm:$0xff]  ;;  %v866_v23 = vld [vmem:[%s279_s10 + $0x1] ss:$2 sm:$0x3]  ;;  %p1053_p12 = pnand %p1052_p11, %p1181_p5 }
  0x1b   : > { %v290_v17 = vld [vmem:[%s279_s10] ss:$2 sm:$0x3]  ;;  %v371_v26 = vperm.slane %v866_v23, 0  ;;  %v372_v27 = vperm.slane %v866_v23, 1  ;;  %v881_v40 = vld [vmem:[%s1361_s4 + $0x30] sm:$0xff]  ;;  %p1058_p2 = por %p1057_p1, %p1056_p0 }
  0x1c   : > { %v312_v21 = vperm.slane %v290_v17, 0  ;;  %v313_v22 = vperm.slane %v290_v17, 1  ;;  %v403_v30 = vld [vmem:[%s1361_s4] sm:$0xff]  ;;  %v404_v48 = vld [vmem:[%s1361_s4 + $0x8] sm:$0xff]  ;;  %v898_v54 = vld [vmem:[%s1361_s4 + $0x58] sm:$0xff]  ;;  %p1054_p13 = pneg %p1053_p12 }
  0x1d   : > { %v879_v0 = vld [vmem:[%s1361_s4 + $0x20] sm:$0xff] }
  0x1e   : > { %v399_v17 = vld [vmem:[%s1360_s3] sm:$0xff]  ;;  %p1059_p3 = pnand %p1058_p2, %p1054_p13 }
  0x20   : > { %336 = vperm.xlu2 %965, %v284_v5  }
  0x21   : > { %303 = vperm.xlu0 %962, %v288_v6   ;;  %964 = vset.pattern.permute.xlu1 %v1100_v7 }
  0x22   : > { %367 = vperm.xlu1 %964, %v289_v1  }
  0x28   : > { %331 = vperm.xlu2 %965, %v283_v8  }
  0x29   : > { %966 = vset.pattern.permute.xlu0 %v1100_v7 }
  0x2a   : > { %363 = vperm.xlu0 %966, %v288_v6   ;;  %967 = vset.pattern.permute.xlu1 %v1099_v4 }
  0x2b   : > { %293 = vperm.xlu1 %967, %v286_v9  }
  0x30   : > { %326 = vperm.xlu2 %965, %v282_v10  }
  0x32   : > { %355 = vperm.xlu0 %966, %v286_v9  }
  0x33   : > { %968 = vset.pattern.permute.xlu1 %v1100_v7 }
  0x34   : > { %359 = vperm.xlu1 %968, %v287_v2  }
  0x38   : > { %419 = vperm.xlu2 %965, %v405_v11  }
  0x3a   : > { %970 = vset.pattern.permute.xlu0 %v1099_v4 }
  0x3b   : > { %414 = vperm.xlu0 %970, %v404_v48   ;;  %v875_v48 = vld [vmem:[%s1360_s3 + $0x20] sm:$0xff] }
  0x3c   : > { %969 = vset.pattern.permute.xlu1 %v1099_v4 }
  0x3d   : > { %424 = vperm.xlu1 %969, %v406_v20   ;;  %v400_v20 = vld [vmem:[%s1360_s3 + $0x8] sm:$0xff] }
  0x40   : > { %533 = vperm.xlu2 %965, %v882_v12   ;;  %v895_v12 = vld [vmem:[%s1361_s4 + $0x40] sm:$0xff] }
  0x43   : > { %518 = vperm.xlu0 %970, %v879_v0  }
  0x45   : > { %409 = vperm.xlu1 %969, %v403_v30  }
  0x48   : > { %523 = vperm.xlu2 %965, %v880_v13   ;;  %v896_v13 = vld [vmem:[%s1361_s4 + $0x48] sm:$0xff] }
  0x4b   : > { %631 = vperm.xlu0 %970, %v896_v13  }
  0x4d   : > { %528 = vperm.xlu1 %969, %v881_v40  }
  0x50   : > { %636 = vperm.xlu2 %965, %v897_v14  }
  0x55   : > { %641 = vperm.xlu1 %969, %v898_v54  }
  0x58   : > { %726 = vperm.xlu2 %965, %v723_v15  }
  0x5d   : > { %626 = vperm.xlu1 %969, %v895_v12  }
  0x72   : > { %v299_v16 = vpop.permute.xlu2 %298 }
  0x73   : > { %v318_v53 = vmul.f32 %v312_v21, %v299_v16  ;;  %v319_v55 = vmul.f32 %v313_v22, %v299_v16 }
  0x7a   : > { %v337_v28 = vpop.permute.xlu2 %336 }
  0x82   : > { %v332_v41 = vpop.permute.xlu2 %331 }
  0x83   : > { %v346_v60 = vadd.f32 %v332_v41, %v318_v53  ;;  %v347_v2 = vadd.f32 %v332_v41, %v319_v55  ;;  %v878_v53 = vld [vmem:[%s1360_s3 + $0x38] sm:$0xff] }
  0x8a   : > { %v327_v61 = vpop.permute.xlu2 %326 }
  0x8b   : > { %v309_v18 = vpop.permute.xlu0 %308  ;;  %v342_v19 = vpop.permute.xlu1 %341 }
  0x8c   : > { %v322_v24 = vmul.f32 %v312_v21, %v309_v18  ;;  %v323_v25 = vmul.f32 %v313_v22, %v309_v18 }
  0x8e   : > { %v350_v32 = vadd.f32 %v342_v19, %v322_v24  ;;  %v351_v33 = vadd.f32 %v342_v19, %v323_v25  ;;  %v402_v19 = vld [vmem:[%s1360_s3 + $0x18] sm:$0xff] }
  0x93   : > { %v304_v29 = vpop.permute.xlu0 %303 }
  0x94   : > { %v368_v31 = vpop.permute.xlu1 %367  ;;  %v320_v38 = vmul.f32 %v312_v21, %v304_v29  ;;  %v321_v39 = vmul.f32 %v313_v22, %v304_v29 }
  0x95   : > { %v381_v34 = vmul.f32 %v371_v26, %v368_v31  ;;  %v382_v35 = vmul.f32 %v372_v27, %v368_v31  ;;  %v420_v31 = vpop.permute.xlu2 %419 }
  0x96   : > { %v348_v43 = vadd.f32 %v337_v28, %v320_v38  ;;  %v349_v44 = vadd.f32 %v337_v28, %v321_v39 }
  0x97   : > { %v389_v36 = vadd.f32 %v381_v34, %v350_v32  ;;  %v390_v37 = vadd.f32 %v382_v35, %v351_v33 }
  0x99   : > { %971 = vtanh.f32 %v389_v36 }
  0x9a   : > { %973 = vtanh.f32 %v390_v37 }
  0x9c   : > { %v364_v42 = vpop.permute.xlu0 %363 }
  0x9d   : > { %v379_v45 = vmul.f32 %v371_v26, %v364_v42  ;;  %v380_v46 = vmul.f32 %v372_v27, %v364_v42  ;;  %v294_v47 = vpop.permute.xlu1 %293 }
  0x9e   : > { %v316_v56 = vmul.f32 %v312_v21, %v294_v47  ;;  %v317_v57 = vmul.f32 %v313_v22, %v294_v47  ;;  %v401_v21 = vld [vmem:[%s1360_s3 + $0x10] sm:$0xff] }
  0x9f   : > { %v972_v49 = vpop.eup %971  ;;  %v387_v50 = vadd.f32 %v379_v45, %v348_v43  ;;  %v388_v51 = vadd.f32 %v380_v46, %v349_v44 }
  0xa0   : > { %v974_v52 = vpop.eup %973  ;;  %452 = vmatpush.msra.mxu0 %v972_v49  ;;  %913 = vmatpush.msra.mxu2 %v972_v49  ;;  %v344_v3 = vadd.f32 %v327_v61, %v316_v56  ;;  %v345_v7 = vadd.f32 %v327_v61, %v317_v57 }
  0xa1   : > { %975 = vtanh.f32 %v387_v50  ;;  %481 = vmatpush.msra.mxu1 %v974_v52  ;;  %917 = vmatpush.msra.mxu3 %v974_v52  ;;  %v877_v52 = vld [vmem:[%s1360_s3 + $0x30] sm:$0xff] }
  0xa2   : > { %977 = vtanh.f32 %v388_v51  ;;  %v876_v51 = vld [vmem:[%s1360_s3 + $0x28] sm:$0xff] }
  0xa4   : > { %v356_v58 = vpop.permute.xlu0 %355 }
  0xa5   : > { %v375_v59 = vmul.f32 %v371_v26, %v356_v58  ;;  %v376_v62 = vmul.f32 %v372_v27, %v356_v58  ;;  %v534_v58 = vpop.permute.xlu2 %533 }
  0xa6   : > { %v360_v63 = vpop.permute.xlu1 %359 }
  0xa7   : > { %v976_v1 = vpop.eup %975  ;;  %v377_v4 = vmul.f32 %v371_v26, %v360_v63  ;;  %v378_v5 = vmul.f32 %v372_v27, %v360_v63  ;;  %v383_v8 = vadd.f32 %v375_v59, %v344_v3  ;;  %v384_v11 = vadd.f32 %v376_v62, %v345_v7 }
  0xa8   : > { %v978_v6 = vpop.eup %977  ;;  %453 = vmatpush.msra.mxu0 %v976_v1  ;;  %914 = vmatpush.msra.mxu2 %v976_v1 }
  0xa9   : > { %v385_v9 = vadd.f32 %v377_v4, %v346_v60  ;;  %v386_v10 = vadd.f32 %v378_v5, %v347_v2  ;;  %482 = vmatpush.msra.mxu1 %v978_v6  ;;  %918 = vmatpush.msra.mxu3 %v978_v6 }
  0xab   : > { %979 = vtanh.f32 %v385_v9 }
  0xac   : > { %981 = vtanh.f32 %v386_v10 }
  0xad   : > { %983 = vtanh.f32 %v383_v8  ;;  %v415_v32 = vpop.permute.xlu0 %414  ;;  %v524_v2 = vpop.permute.xlu2 %523 }
  0xae   : > { %985 = vtanh.f32 %v384_v11 }
  0xaf   : > { %v425_v24 = vpop.permute.xlu1 %424 }
  0xb1   : > { %v980_v14 = vpop.eup %979 }
  0xb2   : > { %v982_v15 = vpop.eup %981  ;;  %454 = vmatpush.msra.mxu0 %v980_v14  ;;  %915 = vmatpush.msra.mxu2 %v980_v14 }
  0xb3   : > { %v984_v16 = vpop.eup %983  ;;  %483 = vmatpush.msra.mxu1 %v982_v15  ;;  %919 = vmatpush.msra.mxu3 %v982_v15 }
  0xb4   : > { %v986_v18 = vpop.eup %985  ;;  %455 = vmatpush.msra.mxu0 %v984_v16  ;;  %916 = vmatpush.msra.mxu2 %v984_v16  ;;  %v891_v16 = vld [vmem:[%s1360_s3 + $0x40] sm:$0xff] }
  0xb5   : > { %484 = vmatpush.msra.mxu1 %v986_v18  ;;  %920 = vmatpush.msra.mxu3 %v986_v18  ;;  %v519_v6 = vpop.permute.xlu0 %518 }
  0xb6   : > { %867 = vmatmul.msk.f32.vlgmr.msra.gmra.mxu0 %vm427_vm0, %v399_v17  ;;  %871 = vmatmul.msk.f32.vlgmr.msra.gmra.mxu1 %vm427_vm0, %v399_v17 }
  0xb7   : > { %870 = vmatmul.msk.f32.vlgmr.msra.gmra.mxu2 %vm427_vm0, %v402_v19  ;;  %874 = vmatmul.msk.f32.vlgmr.msra.gmra.mxu3 %vm427_vm0, %v402_v19  ;;  %v410_v39 = vpop.permute.xlu1 %409  ;;  %v892_v19 = vld [vmem:[%s1360_s3 + $0x48] sm:$0xff] }
  0xbe   : > { %868 = vmatmul.msk.f32.gmra.mxu0 %vm427_vm0, %v400_v20  ;;  %872 = vmatmul.msk.f32.gmra.mxu1 %vm427_vm0, %v400_v20  ;;  %v893_v20 = vld [vmem:[%s1360_s3 + $0x50] sm:$0xff] }
  0xbf   : > { %v529_v61 = vpop.permute.xlu1 %528 }
  0xc6   : > { %869 = vmatmul.msk.f32.gmra.mxu0 %vm427_vm0, %v401_v21  ;;  %873 = vmatmul.msk.f32.gmra.mxu1 %vm427_vm0, %v401_v21  ;;  %v894_v21 = vld [vmem:[%s1360_s3 + $0x58] sm:$0xff] }
 0x133   : > { %v457_v22 = vpop.f32.mrf.mxu0  ;;  %v486_v23 = vpop.f32.mrf.mxu1 }
 0x134   : > { %v458_v42 = vadd.f32 %v457_v22, %v410_v39  ;;  %v487_v43 = vadd.f32 %v486_v23, %v410_v39 }
 0x13a   : > { %v466_v25 = vpop.f32.mrf.mxu2  ;;  %v495_v26 = vpop.f32.mrf.mxu3 }
 0x13b   : > { %v460_v27 = vpop.f32.mrf.mxu0  ;;  %v489_v28 = vpop.f32.mrf.mxu1  ;;  %v467_v29 = vadd.f32 %v466_v25, %v425_v24  ;;  %v496_v30 = vadd.f32 %v495_v26, %v425_v24 }
 0x13c   : > { %v461_v36 = vadd.f32 %v460_v27, %v415_v32  ;;  %v490_v40 = vadd.f32 %v489_v28, %v415_v32  ;;  %v642_v28 = vpop.permute.xlu1 %641 }
 0x13d   : > { %987 = vtanh.f32 %v467_v29  ;;  %v637_v29 = vpop.permute.xlu2 %636 }
 0x13e   : > { %989 = vtanh.f32 %v496_v30 }
 0x143   : > { %v988_v33 = vpop.eup %987  ;;  %v463_v34 = vpop.f32.mrf.mxu0 }
 0x144   : > { %v492_v35 = vpop.f32.mrf.mxu1  ;;  %v464_v37 = vadd.f32 %v463_v34, %v420_v31  ;;  %560 = vmatpush.msrb.mxu2 %v988_v33  ;;  %v990_v41 = vpop.eup %989 }
 0x145   : > { %v493_v38 = vadd.f32 %v492_v35, %v420_v31  ;;  %589 = vmatpush.msrb.mxu3 %v990_v41  ;;  %v632_v34 = vpop.permute.xlu0 %631 }
 0x146   : > { %991 = vtanh.f32 %v464_v37 }
 0x147   : > { %993 = vtanh.f32 %v493_v38  ;;  %v627_v38 = vpop.permute.xlu1 %626 }
 0x148   : > { %995 = vtanh.f32 %v461_v36 }
 0x149   : > { %997 = vtanh.f32 %v490_v40 }
 0x14a   : > { %999 = vtanh.f32 %v458_v42 }
 0x14b   : > { %1001 = vtanh.f32 %v487_v43 }
 0x14c   : > { %v992_v44 = vpop.eup %991 }
 0x14d   : > { %v994_v45 = vpop.eup %993  ;;  %561 = vmatpush.msrb.mxu2 %v992_v44 }
 0x14e   : > { %v996_v46 = vpop.eup %995  ;;  %590 = vmatpush.msrb.mxu3 %v994_v45 }
 0x14f   : > { %v998_v47 = vpop.eup %997  ;;  %562 = vmatpush.msrb.mxu2 %v996_v46 }
 0x150   : > { %v1000_v49 = vpop.eup %999  ;;  %591 = vmatpush.msrb.mxu3 %v998_v47 }
 0x151   : > { %v1002_v50 = vpop.eup %1001  ;;  %563 = vmatpush.msrb.mxu2 %v1000_v49 }
 0x152   : > { %592 = vmatpush.msrb.mxu3 %v1002_v50  ;;  %883 = vmatmul.msk.f32.vlgmr.msrb.gmra.mxu2 %vm427_vm0, %v875_v48 }
 0x153   : > { %887 = vmatmul.msk.f32.vlgmr.msrb.gmra.mxu3 %vm427_vm0, %v875_v48  ;;  %v722_v48 = vld [vmem:[%s1362_s5] sm:$0x1] }
 0x15a   : > { %884 = vmatmul.msk.f32.gmra.mxu2 %vm427_vm0, %v876_v51 }
 0x15b   : > { %888 = vmatmul.msk.f32.gmra.mxu3 %vm427_vm0, %v876_v51  ;;  %v727_v51 = vpop.permute.xlu2 %726 }
 0x162   : > { %885 = vmatmul.msk.f32.gmra.mxu2 %vm427_vm0, %v877_v52 }
 0x163   : > { %889 = vmatmul.msk.f32.gmra.mxu3 %vm427_vm0, %v877_v52  ;;  %v729_v52 = vperm.slane %v727_v51, 0 }
 0x16a   : > { %886 = vmatmul.msk.f32.gmra.mxu2 %vm427_vm0, %v878_v53 }
 0x16b   : > { %890 = vmatmul.msk.f32.gmra.mxu3 %vm427_vm0, %v878_v53  ;;  %v779_v53 = vlaneseq }
 0x16d   : > { %vm781_vm2 = vcmp.lt.s32.totalorder %v779_v53, 256 }
 0x1d5   : > { %v565_v54 = vpop.f32.mrf.mxu2 }
 0x1d6   : > { %v594_v55 = vpop.f32.mrf.mxu3  ;;  %v566_v8 = vadd.f32 %v565_v54, %v519_v6 }
 0x1d7   : > { %v595_v9 = vadd.f32 %v594_v55, %v519_v6 }
 0x1dd   : > { %v568_v56 = vpop.f32.mrf.mxu2 }
 0x1de   : > { %v597_v57 = vpop.f32.mrf.mxu3  ;;  %v569_v5 = vadd.f32 %v568_v56, %v524_v2 }
 0x1df   : > { %v598_v7 = vadd.f32 %v597_v57, %v524_v2 }
 0x1e5   : > { %v571_v59 = vpop.f32.mrf.mxu2 }
 0x1e6   : > { %v600_v60 = vpop.f32.mrf.mxu3  ;;  %v572_v63 = vadd.f32 %v571_v59, %v529_v61 }
 0x1e7   : > { %v601_v3 = vadd.f32 %v600_v60, %v529_v61 }
 0x1ed   : > { %v574_v62 = vpop.f32.mrf.mxu2 }
 0x1ee   : > { %v575_v0 = vadd.f32 %v574_v62, %v534_v58  ;;  %v603_v1 = vpop.f32.mrf.mxu3 }
 0x1ef   : > { %v604_v4 = vadd.f32 %v603_v1, %v534_v58 }
 0x1f0   : > { %1003 = vtanh.f32 %v575_v0 }
 0x1f1   : > { %1005 = vtanh.f32 %v604_v4 }
 0x1f2   : > { %1007 = vtanh.f32 %v572_v63 }
 0x1f3   : > { %1009 = vtanh.f32 %v601_v3 }
 0x1f4   : > { %1011 = vtanh.f32 %v569_v5 }
 0x1f5   : > { %1013 = vtanh.f32 %v598_v7 }
 0x1f6   : > { %v1004_v10 = vpop.eup %1003  ;;  %1015 = vtanh.f32 %v566_v8 }
 0x1f7   : > { %v1006_v11 = vpop.eup %1005  ;;  %1017 = vtanh.f32 %v595_v9  ;;  %668 = vmatpush.msrb.mxu0 %v1004_v10 }
 0x1f8   : > { %v1008_v12 = vpop.eup %1007  ;;  %697 = vmatpush.msrb.mxu1 %v1006_v11 }
 0x1f9   : > { %v1010_v13 = vpop.eup %1009  ;;  %669 = vmatpush.msrb.mxu0 %v1008_v12 }
 0x1fa   : > { %v1012_v14 = vpop.eup %1011  ;;  %698 = vmatpush.msrb.mxu1 %v1010_v13 }
 0x1fb   : > { %v1014_v15 = vpop.eup %1013  ;;  %670 = vmatpush.msrb.mxu0 %v1012_v14 }
 0x1fc   : > { %v1016_v17 = vpop.eup %1015  ;;  %699 = vmatpush.msrb.mxu1 %v1014_v15 }
 0x1fd   : > { %v1018_v18 = vpop.eup %1017  ;;  %671 = vmatpush.msrb.mxu0 %v1016_v17 }
 0x1fe   : > { %700 = vmatpush.msrb.mxu1 %v1018_v18  ;;  %899 = vmatmul.msk.f32.vlgmr.msrb.gmra.mxu0 %vm427_vm0, %v891_v16 }
 0x1ff   : > { %903 = vmatmul.msk.f32.vlgmr.msrb.gmra.mxu1 %vm427_vm0, %v891_v16 }
 0x206   : > { %900 = vmatmul.msk.f32.gmra.mxu0 %vm427_vm0, %v892_v19 }
 0x207   : > { %904 = vmatmul.msk.f32.gmra.mxu1 %vm427_vm0, %v892_v19 }
 0x20e   : > { %901 = vmatmul.msk.f32.gmra.mxu0 %vm427_vm0, %v893_v20 }
 0x20f   : > { %905 = vmatmul.msk.f32.gmra.mxu1 %vm427_vm0, %v893_v20 }
 0x216   : > { %902 = vmatmul.msk.f32.gmra.mxu0 %vm427_vm0, %v894_v21 }
 0x217   : > { %906 = vmatmul.msk.f32.gmra.mxu1 %vm427_vm0, %v894_v21 }
 0x27b   : > { %v673_v22 = vpop.f32.mrf.mxu0 }
 0x27c   : > { %v702_v23 = vpop.f32.mrf.mxu1  ;;  %v674_v40 = vadd.f32 %v673_v22, %v627_v38 }
 0x27d   : > { %v703_v41 = vadd.f32 %v702_v23, %v627_v38 }
 0x283   : > { %v676_v24 = vpop.f32.mrf.mxu0 }
 0x284   : > { %v705_v25 = vpop.f32.mrf.mxu1  ;;  %v677_v37 = vadd.f32 %v676_v24, %v632_v34 }
 0x285   : > { %v706_v39 = vadd.f32 %v705_v25, %v632_v34 }
 0x28b   : > { %v679_v26 = vpop.f32.mrf.mxu0 }
 0x28c   : > { %v708_v27 = vpop.f32.mrf.mxu1  ;;  %v680_v31 = vadd.f32 %v679_v26, %v637_v29 }
 0x28d   : > { %v709_v35 = vadd.f32 %v708_v27, %v637_v29 }
 0x293   : > { %v682_v30 = vpop.f32.mrf.mxu0 }
 0x294   : > { %v683_v32 = vadd.f32 %v682_v30, %v642_v28  ;;  %v711_v33 = vpop.f32.mrf.mxu1 }
 0x295   : > { %v712_v36 = vadd.f32 %v711_v33, %v642_v28 }
 0x296   : > { %1019 = vtanh.f32 %v683_v32 }
 0x297   : > { %1021 = vtanh.f32 %v712_v36 }
 0x298   : > { %1023 = vtanh.f32 %v680_v31 }
 0x299   : > { %1025 = vtanh.f32 %v709_v35 }
 0x29a   : > { %1027 = vtanh.f32 %v677_v37 }
 0x29b   : > { %1029 = vtanh.f32 %v706_v39 }
 0x29c   : > { %v1020_v42 = vpop.eup %1019  ;;  %1031 = vtanh.f32 %v674_v40 }
 0x29d   : > { %v1022_v43 = vpop.eup %1021  ;;  %1033 = vtanh.f32 %v703_v41  ;;  %745 = vmatpush.msra.mxu2 %v1020_v42 }
 0x29e   : > { %v1024_v44 = vpop.eup %1023  ;;  %765 = vmatpush.msra.mxu3 %v1022_v43 }
 0x29f   : > { %v1026_v45 = vpop.eup %1025  ;;  %746 = vmatpush.msra.mxu2 %v1024_v44 }
 0x2a0   : > { %v1028_v46 = vpop.eup %1027  ;;  %766 = vmatpush.msra.mxu3 %v1026_v45 }
 0x2a1   : > { %v1030_v47 = vpop.eup %1029  ;;  %747 = vmatpush.msra.mxu2 %v1028_v46 }
 0x2a2   : > { %v1032_v49 = vpop.eup %1031  ;;  %767 = vmatpush.msra.mxu3 %v1030_v47 }
 0x2a3   : > { %v1034_v50 = vpop.eup %1033  ;;  %748 = vmatpush.msra.mxu2 %v1032_v49 }
 0x2a4   : > { %768 = vmatpush.msra.mxu3 %v1034_v50  ;;  %907 = vmatmul.msk.f32.vlgmr.msra.gmra.mxu2 %vm427_vm0, %v722_v48 }
 0x2a5   : > { %908 = vmatmul.msk.f32.vlgmr.msra.gmra.mxu3 %vm427_vm0, %v722_v48 }
 0x327   : > { %v750_v54 = vpop.f32.mrf.mxu2 }
 0x328   : > { %v770_v55 = vpop.f32.mrf.mxu3  ;;  %v751_v57 = vadd.f32 %v750_v54, %v729_v52 }
 0x329   : > { %v771_v56 = vadd.f32 %v770_v55, %v729_v52 }
 0x32b   : > { %v775_v58 = vrot.slane %v771_v56, 7 }
 0x32d   : > { %v777_v59 = vsel %vm776_vm1, %v751_v57, %v775_v58 }
 0x32e   : > { %783 = vst.msk [vmem:[%s274_s6] sm:$0x3] %vm781_vm2, %v777_v59 }
 0x32f   : > { %1062 = shalt.err (!%p1059_p3)
}
 0x330   : > { %921 = dma.vmem_to_hbm [thread:$0]  (%p1181_p5), %s798_s16, 32, %s800_s17, %s785_s18  }
 0x331 PF: > { %p927_p4 = scmp.ge.s32.totalorder %s1097_s29, 2  ;;  %s811_s30 = sand.u32 1, %s1085_s26  }
 0x332   : > { %s812_s9 = scalar_lea.sflag [#allocation4], %s811_s30 }
 0x333   : > { %p924_p7 = pnand %p927_p4, %p1185_p6 }
 0x335   : > { %p925_p8 = pneg %p924_p7 }
 0x337   : > { %1080 = dma.done.wait (%p925_p8), %s812_s9, 32  }
 0x338   : > { %1082 = vsyncadd (%p925_p8), %s812_s9, 4294967264  ;;  %p19_p9 = scmp.ge.s32.totalorder %s1167_s8, 4   ;;  %s1367_s26 = smov %s1089_s27 }
 0x339   : > { %s1368_s27 = smov %s1093_s28  ;;  %s1369_s28 = smov %s1179_s11 }
 0x33a   : > { %s1370_s29 = smov %s1167_s8  ;;  %21 = sbr.rel (!%p19_p9) target bundleno = 6 (0x6), region = 88 }
 0x33f   :  { %818 = vsyncpa [#allocation4], 1 }
 0x340   :  { %820 = vsyncpa [#allocation4 + $0x1], 1 }

</bundles_post_ra>
